<compile_context>
chip_gen: v5e
topology: v5e:2x2
jax: 0.10.0
libtpu: 0.0.40
codegen_flags: <defaults>
</compile_context>

<pallas_src>
import numpy as np
import jax
import jax.numpy as jnp
from jax.experimental import pallas as pl
from jax.experimental.pallas import tpu as pltpu


def _msr_kernel(w_ref, fr_ref, len_ref, x_ref, o_ref):
    """One (R, T) block of rows per grid step.

    w_ref:   SMEM (15,)  float32  concat of w1(3), w2(5), w3(7)
    fr_ref:  SMEM (3,)   float32  fusion rates (already softmaxed)
    len_ref: VMEM (R, 1) int32    valid lengths (0 for padded rows)
    x_ref:   VMEM (R, T) float32  batch rows (>=3 zero tail cols guaranteed)
    o_ref:   VMEM (R, 1) float32  fused score per row
    """
    R, T = x_ref.shape
    lengths = len_ref[...]                                    # (R, 1) int32
    col = jax.lax.broadcasted_iota(jnp.int32, (R, T), 1)      # lane index
    valid = col < lengths                                     # (R, T) bool
    # Zero everything at/past the valid length (== conv1d zero padding).
    q = jnp.where(valid, x_ref[...], 0.0)

    # 7 shifted copies of q (shifts -3..+3), shared by all three branches.
    # No boundary masks: the wrapper guarantees length <= T - 3, so positive
    # rolls wrap only zeros into t < 3, and whatever negative rolls wrap into
    # the last <=3 columns lands at t >= length and is killed by the -1e30
    # logits mask below.
    shifted = {0: q}
    for s in (1, 2, 3):
        shifted[s] = pltpu.roll(q, shift=s, axis=1)           # q[r, t - s]
        shifted[-s] = pltpu.roll(q, shift=T - s, axis=1)      # q[r, t + s]

    # Hoist the 15 + 3 SMEM scalar reads out of the unrolled conv loops so
    # each scalar is materialized (broadcast) once, not per use per branch.
    w = [w_ref[i] for i in range(15)]
    fr = [fr_ref[i] for i in range(3)]

    fused = jnp.zeros((R, 1), jnp.float32)
    for (K, off, rate) in ((3, 0, fr[0]), (5, 3, fr[1]), (7, 8, fr[2])):
        P = (K - 1) // 2
        # Cross-correlation matching F.conv1d: out[t] = sum_k q[t + k - P] * w[k].
        conv = shifted[P] * w[off]
        for k in range(1, K):
            conv = conv + shifted[P - k] * w[off + k]
        # Masked softmax over the valid prefix, fused with the weighted sum.
        logits = jnp.where(valid, conv, -1e30)
        m = jnp.max(logits, axis=-1, keepdims=True)
        e = jnp.exp(logits - m)                               # exp(-1e30 - m) == 0 in f32
        num = jnp.sum(e * q, axis=-1, keepdims=True)          # (R, 1)
        den = jnp.sum(e, axis=-1, keepdims=True)              # (R, 1)
        den = jnp.where(den > 0.0, den, 1.0)                  # cheap (R,1) safety guard
        rcp = pl.reciprocal(den, approx=True)                 # EUP slot
        rcp = rcp * (2.0 - den * rcp)                         # one Newton step -> f32 accurate
        fused = fused + rate * (num * rcp)                    # == fr * sum(softmax(conv) * q)

    # (R, 1) output store is lane-sparse but negligible vs the (R, T) reads.
    o_ref[...] = fused


def _round_up(v, m):
    return ((v + m - 1) // m) * m


def _vmem_capacity_bytes():
    """Generation-aware VMEM capacity; conservative fallback if query fails."""
    try:
        info = pltpu.get_tpu_info()
        cap = getattr(info, "vmem_capacity_bytes", None)
        if cap:
            return int(cap)
    except Exception:
        pass
    return 64 * 1024 * 1024  # v7x per-TC size: safe lower bound everywhere


def multiscale_recall(x, length, w1, w2, w3, w_fusion, *, rows_per_block=None):
    """Pallas implementation of MultiScaleRecall.forward.

    x:        (B, T) float32
    length:   (B,)   int-like
    w1/w2/w3: (1, 1, 3) / (1, 1, 5) / (1, 1, 7) float32
    w_fusion: (15, 3) float32
    returns:  (B, 1) float32
    """
    B, T = x.shape
    x = x.astype(jnp.float32)
    lengths = length.astype(jnp.int32)

    w_all = jnp.concatenate(
        [w1.reshape(-1), w2.reshape(-1), w3.reshape(-1)]
    ).astype(jnp.float32)                                     # (15,)

    # Parameter-only fusion gate (glue): softmax(leaky_relu(kernelInfo @ wFusion))
    kernel_info = w_all.reshape(1, -1)                        # (1, 15)
    z = jax.nn.leaky_relu(kernel_info @ w_fusion.astype(jnp.float32),
                          negative_slope=0.01).reshape(-1)    # (3,)
    fusion_rate = jax.nn.softmax(z).astype(jnp.float32)       # (3,)

    # Pad T to a multiple of 128 with >= 3 guaranteed-zero trailing columns so
    # the in-kernel rolls need no boundary masks (length <= T <= T_pad - 3).
    T_pad = _round_up(max(T, 1) + 3, 128)

    # Generation-aware VMEM budget: leave ~15% headroom for Mosaic internal
    # scratch (critical on v7x's 64 MiB parts; generous on 128 MiB v5e/v6e).
    vmem_cap = _vmem_capacity_bytes()
    vmem_limit = int(vmem_cap * 0.85)

    # Rows per block: largest multiple of 8 such that ~14 live (R, T_pad)
    # 32-bit buffers (2 double-buffered input blocks, q, 6 shifted copies,
    # conv, exp temp, int32 iota, mask + slack) fit the budget; also cap at
    # round_up(ceil(B/2), 8) so the batch grid splits across both v7x TCs.
    if rows_per_block is None:
        budget = int(vmem_limit * 0.9)
        r_cap = max(8, (budget // (14 * T_pad * 4)) // 8 * 8)
        half_rows = _round_up(max((B + 1) // 2, 8), 8)
        R = min(1024, r_cap, half_rows)
    else:
        R = _round_up(rows_per_block, 8)
    # TODO(synk): for very long sequences (14 * 8 * T_pad * 4 > budget) add an
    # inner "arbitrary" T-tile axis with online-softmax (m, num, den) carried
    # in (R, 1) scratch and a +-3-column halo, instead of one (R, T_pad) tile.
    G = (B + R - 1) // R
    B_pad = G * R

    x_p = jnp.zeros((B_pad, T_pad), jnp.float32).at[:B, :T].set(x)
    len_p = jnp.zeros((B_pad, 1), jnp.int32).at[:B, 0].set(lengths)

    out = pl.pallas_call(
        _msr_kernel,
        out_shape=jax.ShapeDtypeStruct((B_pad, 1), jnp.float32),
        grid=(G,),
        in_specs=[
            pl.BlockSpec(memory_space=pltpu.MemorySpace.SMEM),   # w_all (15,)
            pl.BlockSpec(memory_space=pltpu.MemorySpace.SMEM),   # fusion_rate (3,)
            pl.BlockSpec((R, 1), lambda g: (g, 0)),              # lengths block
            pl.BlockSpec((R, T_pad), lambda g: (g, 0)),          # x rows block
        ],
        out_specs=pl.BlockSpec((R, 1), lambda g: (g, 0)),
        compiler_params=pltpu.CompilerParams(
            dimension_semantics=("parallel",),
            vmem_limit_bytes=vmem_limit),
    )(w_all, fusion_rate, len_p, x_p)
    return out[:B]


def _reference_forward(x, lengths, w1, w2, w3, wf):
    """Pure numpy port of the PyTorch forward (float64) for verification."""
    w1 = np.asarray(w1).reshape(-1)
    w2 = np.asarray(w2).reshape(-1)
    w3 = np.asarray(w3).reshape(-1)
    wf = np.asarray(wf, dtype=np.float64)
    kernel_info = np.concatenate([w1, w2, w3]).reshape(1, -1).astype(np.float64)
    z = kernel_info @ wf
    z = np.where(z >= 0, z, 0.01 * z).reshape(-1)
    e = np.exp(z - z.max())
    fr = e / e.sum()

    outs = []
    for i in range(x.shape[0]):
        L = int(lengths[i])
        q = np.asarray(x[i, :L], dtype=np.float64)

        def score(w):
            K = len(w)
            P = (K - 1) // 2
            qp = np.concatenate([np.zeros(P), q, np.zeros(P)])
            conv = np.array([np.dot(qp[t:t + K], w) for t in range(L)])
            ee = np.exp(conv - conv.max())
            p = ee / ee.sum()
            return float(np.sum(p * q))

        s = fr[0] * score(w1) + fr[1] * score(w2) + fr[2] * score(w3)
        outs.append([s])
    return np.array(outs, dtype=np.float32)


if __name__ == "__main__":
    key = jax.random.PRNGKey(0)
    k_x, k_w1, k_w2, k_w3, k_wf, k_x2 = jax.random.split(key, 6)

    # Deterministic parameter init, matching the module's shapes (~N(0, 0.01)).
    w1 = 0.01 * jax.random.normal(k_w1, (1, 1, 3), dtype=jnp.float32)
    w2 = 0.01 * jax.random.normal(k_w2, (1, 1, 5), dtype=jnp.float32)
    w3 = 0.01 * jax.random.normal(k_w3, (1, 1, 7), dtype=jnp.float32)
    w_fusion = 0.01 * jax.random.normal(k_wf, (15, 3), dtype=jnp.float32)

    # Case 1: small batch, one row with length == T (exercises the "length
    # reaches the padded tail" case that the mask-free rolls must handle).
    B, T = 2, 128
    x = jax.random.normal(k_x, (B, T), dtype=jnp.float32)
    length = jnp.array([77, 128], dtype=jnp.int32)
    out = jax.block_until_ready(multiscale_recall(x, length, w1, w2, w3, w_fusion))
    ref = _reference_forward(np.asarray(x), np.asarray(length),
                             np.asarray(w1), np.asarray(w2), np.asarray(w3),
                             np.asarray(w_fusion))
    np.testing.assert_allclose(np.asarray(out), ref, rtol=2e-4, atol=2e-5)

    # Case 2: ragged T (padded to 128), ragged lengths, multi-block grid (G=2)
    # plus zero-length padded rows crossing a block boundary.
    B2, T2 = 10, 100
    x2 = jax.random.normal(k_x2, (B2, T2), dtype=jnp.float32)
    length2 = jnp.array([100, 1, 37, 64, 100, 5, 99, 13, 72, 28], dtype=jnp.int32)
    out2 = jax.block_until_ready(
        multiscale_recall(x2, length2, w1, w2, w3, w_fusion, rows_per_block=8))
    ref2 = _reference_forward(np.asarray(x2), np.asarray(length2),
                              np.asarray(w1), np.asarray(w2), np.asarray(w3),
                              np.asarray(w_fusion))
    np.testing.assert_allclose(np.asarray(out2), ref2, rtol=2e-4, atol=2e-5)

    print("KERNEL_OK")
</pallas_src>

<mosaic_0001>
module attributes {stable_mosaic.version = 11 : i64} {
  func.func @_msr_kernel(%arg0: i32, %arg1: memref<15xf32, #tpu.memory_space<smem>>, %arg2: memref<3xf32, #tpu.memory_space<smem>>, %arg3: memref<8x1xi32, #tpu.memory_space<vmem>>, %arg4: memref<8x256xf32, #tpu.memory_space<vmem>>, %arg5: memref<8x1xf32, #tpu.memory_space<vmem>>) attributes {dimension_semantics = [#tpu.dimension_semantics<parallel>], iteration_bounds = array<i64: 1>, scalar_prefetch = 0 : i64, scratch_operands = 0 : i64, tpu.core_type = #tpu.core_type<tc>, window_params = [{transform_indices = @transform_0, window_bounds = array<i64: 15>}, {transform_indices = @transform_1, window_bounds = array<i64: 3>}, {transform_indices = @transform_2, window_bounds = array<i64: 8, 1>}, {transform_indices = @transform_3, window_bounds = array<i64: 8, 256>}, {transform_indices = @transform_4, window_bounds = array<i64: 8, 1>}]} {
    %c0 = arith.constant 0 : index
    %c0_0 = arith.constant 0 : index
    %0 = vector.load %arg3[%c0, %c0_0] : memref<8x1xi32, #tpu.memory_space<vmem>>, vector<8x1xi32>
    %1 = tpu.iota {dimensions = array<i32: 1>} : vector<8x256xi32>
    %2 = vector.broadcast %0 : vector<8x1xi32> to vector<8x256xi32>
    %3 = arith.cmpi slt, %1, %2 : vector<8x256xi32>
    %c0_1 = arith.constant 0 : index
    %c0_2 = arith.constant 0 : index
    %4 = vector.load %arg4[%c0_1, %c0_2] : memref<8x256xf32, #tpu.memory_space<vmem>>, vector<8x256xf32>
    %cst = arith.constant 0.000000e+00 : f32
    %5 = vector.broadcast %cst : f32 to vector<8x256xf32>
    %6 = arith.select %3, %4, %5 : vector<8x256xi1>, vector<8x256xf32>
    %c1_i32 = arith.constant 1 : i32
    %7 = tpu.dynamic_rotate %6 by %c1_i32 dim 1 : vector<8x256xf32>, i32 -> vector<8x256xf32>
    %c255_i32 = arith.constant 255 : i32
    %8 = tpu.dynamic_rotate %6 by %c255_i32 dim 1 : vector<8x256xf32>, i32 -> vector<8x256xf32>
    %c2_i32 = arith.constant 2 : i32
    %9 = tpu.dynamic_rotate %6 by %c2_i32 dim 1 : vector<8x256xf32>, i32 -> vector<8x256xf32>
    %c254_i32 = arith.constant 254 : i32
    %10 = tpu.dynamic_rotate %6 by %c254_i32 dim 1 : vector<8x256xf32>, i32 -> vector<8x256xf32>
    %c3_i32 = arith.constant 3 : i32
    %11 = tpu.dynamic_rotate %6 by %c3_i32 dim 1 : vector<8x256xf32>, i32 -> vector<8x256xf32>
    %c253_i32 = arith.constant 253 : i32
    %12 = tpu.dynamic_rotate %6 by %c253_i32 dim 1 : vector<8x256xf32>, i32 -> vector<8x256xf32>
    %c0_3 = arith.constant 0 : index
    %13 = memref.load %arg1[%c0_3] : memref<15xf32, #tpu.memory_space<smem>>
    %c1 = arith.constant 1 : index
    %14 = memref.load %arg1[%c1] : memref<15xf32, #tpu.memory_space<smem>>
    %c2 = arith.constant 2 : index
    %15 = memref.load %arg1[%c2] : memref<15xf32, #tpu.memory_space<smem>>
    %c3 = arith.constant 3 : index
    %16 = memref.load %arg1[%c3] : memref<15xf32, #tpu.memory_space<smem>>
    %c4 = arith.constant 4 : index
    %17 = memref.load %arg1[%c4] : memref<15xf32, #tpu.memory_space<smem>>
    %c5 = arith.constant 5 : index
    %18 = memref.load %arg1[%c5] : memref<15xf32, #tpu.memory_space<smem>>
    %c6 = arith.constant 6 : index
    %19 = memref.load %arg1[%c6] : memref<15xf32, #tpu.memory_space<smem>>
    %c7 = arith.constant 7 : index
    %20 = memref.load %arg1[%c7] : memref<15xf32, #tpu.memory_space<smem>>
    %c8 = arith.constant 8 : index
    %21 = memref.load %arg1[%c8] : memref<15xf32, #tpu.memory_space<smem>>
    %c9 = arith.constant 9 : index
    %22 = memref.load %arg1[%c9] : memref<15xf32, #tpu.memory_space<smem>>
    %c10 = arith.constant 10 : index
    %23 = memref.load %arg1[%c10] : memref<15xf32, #tpu.memory_space<smem>>
    %c11 = arith.constant 11 : index
    %24 = memref.load %arg1[%c11] : memref<15xf32, #tpu.memory_space<smem>>
    %c12 = arith.constant 12 : index
    %25 = memref.load %arg1[%c12] : memref<15xf32, #tpu.memory_space<smem>>
    %c13 = arith.constant 13 : index
    %26 = memref.load %arg1[%c13] : memref<15xf32, #tpu.memory_space<smem>>
    %c14 = arith.constant 14 : index
    %27 = memref.load %arg1[%c14] : memref<15xf32, #tpu.memory_space<smem>>
    %c0_4 = arith.constant 0 : index
    %28 = memref.load %arg2[%c0_4] : memref<3xf32, #tpu.memory_space<smem>>
    %c1_5 = arith.constant 1 : index
    %29 = memref.load %arg2[%c1_5] : memref<3xf32, #tpu.memory_space<smem>>
    %c2_6 = arith.constant 2 : index
    %30 = memref.load %arg2[%c2_6] : memref<3xf32, #tpu.memory_space<smem>>
    %cst_7 = arith.constant 0.000000e+00 : f32
    %31 = vector.broadcast %cst_7 : f32 to vector<8x1xf32>
    %32 = vector.broadcast %13 : f32 to vector<8x256xf32>
    %33 = arith.mulf %7, %32 : vector<8x256xf32>
    %34 = vector.broadcast %14 : f32 to vector<8x256xf32>
    %35 = arith.mulf %6, %34 : vector<8x256xf32>
    %36 = arith.addf %33, %35 : vector<8x256xf32>
    %37 = vector.broadcast %15 : f32 to vector<8x256xf32>
    %38 = arith.mulf %8, %37 : vector<8x256xf32>
    %39 = arith.addf %36, %38 : vector<8x256xf32>
    %cst_8 = arith.constant -1.000000e+30 : f32
    %40 = vector.broadcast %cst_8 : f32 to vector<8x256xf32>
    %41 = arith.select %3, %39, %40 : vector<8x256xi1>, vector<8x256xf32>
    %cst_9 = arith.constant dense<0xFF800000> : vector<8xf32>
    %42 = vector.multi_reduction <maximumf>, %41, %cst_9 [1] : vector<8x256xf32> to vector<8xf32>
    %43 = vector.shape_cast %42 : vector<8xf32> to vector<8x1xf32>
    %44 = vector.broadcast %43 : vector<8x1xf32> to vector<8x256xf32>
    %45 = arith.subf %41, %44 : vector<8x256xf32>
    %46 = math.exp %45 : vector<8x256xf32>
    %47 = arith.mulf %46, %6 : vector<8x256xf32>
    %cst_10 = arith.constant dense<0.000000e+00> : vector<8xf32>
    %48 = vector.multi_reduction <add>, %47, %cst_10 [1] : vector<8x256xf32> to vector<8xf32>
    %49 = vector.shape_cast %48 : vector<8xf32> to vector<8x1xf32>
    %cst_11 = arith.constant dense<0.000000e+00> : vector<8xf32>
    %50 = vector.multi_reduction <add>, %46, %cst_11 [1] : vector<8x256xf32> to vector<8xf32>
    %51 = vector.shape_cast %50 : vector<8xf32> to vector<8x1xf32>
    %cst_12 = arith.constant 0.000000e+00 : f32
    %52 = vector.broadcast %cst_12 : f32 to vector<8x1xf32>
    %53 = arith.cmpf ogt, %51, %52 : vector<8x1xf32>
    %cst_13 = arith.constant 1.000000e+00 : f32
    %54 = vector.broadcast %cst_13 : f32 to vector<8x1xf32>
    %55 = arith.select %53, %51, %54 : vector<8x1xi1>, vector<8x1xf32>
    %56 = tpu.reciprocal %55 {approx = true} : vector<8x1xf32> -> vector<8x1xf32>
    %57 = arith.mulf %55, %56 : vector<8x1xf32>
    %cst_14 = arith.constant 2.000000e+00 : f32
    %58 = vector.broadcast %cst_14 : f32 to vector<8x1xf32>
    %59 = arith.subf %58, %57 : vector<8x1xf32>
    %60 = arith.mulf %56, %59 : vector<8x1xf32>
    %61 = arith.mulf %49, %60 : vector<8x1xf32>
    %62 = vector.broadcast %28 : f32 to vector<8x1xf32>
    %63 = arith.mulf %62, %61 : vector<8x1xf32>
    %64 = arith.addf %31, %63 : vector<8x1xf32>
    %65 = vector.broadcast %16 : f32 to vector<8x256xf32>
    %66 = arith.mulf %9, %65 : vector<8x256xf32>
    %67 = vector.broadcast %17 : f32 to vector<8x256xf32>
    %68 = arith.mulf %7, %67 : vector<8x256xf32>
    %69 = arith.addf %66, %68 : vector<8x256xf32>
    %70 = vector.broadcast %18 : f32 to vector<8x256xf32>
    %71 = arith.mulf %6, %70 : vector<8x256xf32>
    %72 = arith.addf %69, %71 : vector<8x256xf32>
    %73 = vector.broadcast %19 : f32 to vector<8x256xf32>
    %74 = arith.mulf %8, %73 : vector<8x256xf32>
    %75 = arith.addf %72, %74 : vector<8x256xf32>
    %76 = vector.broadcast %20 : f32 to vector<8x256xf32>
    %77 = arith.mulf %10, %76 : vector<8x256xf32>
    %78 = arith.addf %75, %77 : vector<8x256xf32>
    %cst_15 = arith.constant -1.000000e+30 : f32
    %79 = vector.broadcast %cst_15 : f32 to vector<8x256xf32>
    %80 = arith.select %3, %78, %79 : vector<8x256xi1>, vector<8x256xf32>
    %cst_16 = arith.constant dense<0xFF800000> : vector<8xf32>
    %81 = vector.multi_reduction <maximumf>, %80, %cst_16 [1] : vector<8x256xf32> to vector<8xf32>
    %82 = vector.shape_cast %81 : vector<8xf32> to vector<8x1xf32>
    %83 = vector.broadcast %82 : vector<8x1xf32> to vector<8x256xf32>
    %84 = arith.subf %80, %83 : vector<8x256xf32>
    %85 = math.exp %84 : vector<8x256xf32>
    %86 = arith.mulf %85, %6 : vector<8x256xf32>
    %cst_17 = arith.constant dense<0.000000e+00> : vector<8xf32>
    %87 = vector.multi_reduction <add>, %86, %cst_17 [1] : vector<8x256xf32> to vector<8xf32>
    %88 = vector.shape_cast %87 : vector<8xf32> to vector<8x1xf32>
    %cst_18 = arith.constant dense<0.000000e+00> : vector<8xf32>
    %89 = vector.multi_reduction <add>, %85, %cst_18 [1] : vector<8x256xf32> to vector<8xf32>
    %90 = vector.shape_cast %89 : vector<8xf32> to vector<8x1xf32>
    %cst_19 = arith.constant 0.000000e+00 : f32
    %91 = vector.broadcast %cst_19 : f32 to vector<8x1xf32>
    %92 = arith.cmpf ogt, %90, %91 : vector<8x1xf32>
    %cst_20 = arith.constant 1.000000e+00 : f32
    %93 = vector.broadcast %cst_20 : f32 to vector<8x1xf32>
    %94 = arith.select %92, %90, %93 : vector<8x1xi1>, vector<8x1xf32>
    %95 = tpu.reciprocal %94 {approx = true} : vector<8x1xf32> -> vector<8x1xf32>
    %96 = arith.mulf %94, %95 : vector<8x1xf32>
    %cst_21 = arith.constant 2.000000e+00 : f32
    %97 = vector.broadcast %cst_21 : f32 to vector<8x1xf32>
    %98 = arith.subf %97, %96 : vector<8x1xf32>
    %99 = arith.mulf %95, %98 : vector<8x1xf32>
    %100 = arith.mulf %88, %99 : vector<8x1xf32>
    %101 = vector.broadcast %29 : f32 to vector<8x1xf32>
    %102 = arith.mulf %101, %100 : vector<8x1xf32>
    %103 = arith.addf %64, %102 : vector<8x1xf32>
    %104 = vector.broadcast %21 : f32 to vector<8x256xf32>
    %105 = arith.mulf %11, %104 : vector<8x256xf32>
    %106 = vector.broadcast %22 : f32 to vector<8x256xf32>
    %107 = arith.mulf %9, %106 : vector<8x256xf32>
    %108 = arith.addf %105, %107 : vector<8x256xf32>
    %109 = vector.broadcast %23 : f32 to vector<8x256xf32>
    %110 = arith.mulf %7, %109 : vector<8x256xf32>
    %111 = arith.addf %108, %110 : vector<8x256xf32>
    %112 = vector.broadcast %24 : f32 to vector<8x256xf32>
    %113 = arith.mulf %6, %112 : vector<8x256xf32>
    %114 = arith.addf %111, %113 : vector<8x256xf32>
    %115 = vector.broadcast %25 : f32 to vector<8x256xf32>
    %116 = arith.mulf %8, %115 : vector<8x256xf32>
    %117 = arith.addf %114, %116 : vector<8x256xf32>
    %118 = vector.broadcast %26 : f32 to vector<8x256xf32>
    %119 = arith.mulf %10, %118 : vector<8x256xf32>
    %120 = arith.addf %117, %119 : vector<8x256xf32>
    %121 = vector.broadcast %27 : f32 to vector<8x256xf32>
    %122 = arith.mulf %12, %121 : vector<8x256xf32>
    %123 = arith.addf %120, %122 : vector<8x256xf32>
    %cst_22 = arith.constant -1.000000e+30 : f32
    %124 = vector.broadcast %cst_22 : f32 to vector<8x256xf32>
    %125 = arith.select %3, %123, %124 : vector<8x256xi1>, vector<8x256xf32>
    %cst_23 = arith.constant dense<0xFF800000> : vector<8xf32>
    %126 = vector.multi_reduction <maximumf>, %125, %cst_23 [1] : vector<8x256xf32> to vector<8xf32>
    %127 = vector.shape_cast %126 : vector<8xf32> to vector<8x1xf32>
    %128 = vector.broadcast %127 : vector<8x1xf32> to vector<8x256xf32>
    %129 = arith.subf %125, %128 : vector<8x256xf32>
    %130 = math.exp %129 : vector<8x256xf32>
    %131 = arith.mulf %130, %6 : vector<8x256xf32>
    %cst_24 = arith.constant dense<0.000000e+00> : vector<8xf32>
    %132 = vector.multi_reduction <add>, %131, %cst_24 [1] : vector<8x256xf32> to vector<8xf32>
    %133 = vector.shape_cast %132 : vector<8xf32> to vector<8x1xf32>
    %cst_25 = arith.constant dense<0.000000e+00> : vector<8xf32>
    %134 = vector.multi_reduction <add>, %130, %cst_25 [1] : vector<8x256xf32> to vector<8xf32>
    %135 = vector.shape_cast %134 : vector<8xf32> to vector<8x1xf32>
    %cst_26 = arith.constant 0.000000e+00 : f32
    %136 = vector.broadcast %cst_26 : f32 to vector<8x1xf32>
    %137 = arith.cmpf ogt, %135, %136 : vector<8x1xf32>
    %cst_27 = arith.constant 1.000000e+00 : f32
    %138 = vector.broadcast %cst_27 : f32 to vector<8x1xf32>
    %139 = arith.select %137, %135, %138 : vector<8x1xi1>, vector<8x1xf32>
    %140 = tpu.reciprocal %139 {approx = true} : vector<8x1xf32> -> vector<8x1xf32>
    %141 = arith.mulf %139, %140 : vector<8x1xf32>
    %cst_28 = arith.constant 2.000000e+00 : f32
    %142 = vector.broadcast %cst_28 : f32 to vector<8x1xf32>
    %143 = arith.subf %142, %141 : vector<8x1xf32>
    %144 = arith.mulf %140, %143 : vector<8x1xf32>
    %145 = arith.mulf %133, %144 : vector<8x1xf32>
    %146 = vector.broadcast %30 : f32 to vector<8x1xf32>
    %147 = arith.mulf %146, %145 : vector<8x1xf32>
    %148 = arith.addf %103, %147 : vector<8x1xf32>
    %c0_29 = arith.constant 0 : index
    %c0_30 = arith.constant 0 : index
    %149 = vector.load %arg5[%c0_29, %c0_30] : memref<8x1xf32, #tpu.memory_space<vmem>>, vector<8x1xf32>
    tpu.vector_store %arg5[%c0_29, %c0_30], %148 {strides = array<i32>} : memref<8x1xf32, #tpu.memory_space<vmem>>, vector<8x1xf32>,
    return
  }
  func.func @transform_0(%arg0: i32) -> i32 {
    %c0_i32 = arith.constant 0 : i32
    %c0_i32_0 = arith.constant 0 : i32
    return %c0_i32 : i32
  }
  func.func @transform_1(%arg0: i32) -> i32 {
    %c0_i32 = arith.constant 0 : i32
    %c0_i32_0 = arith.constant 0 : i32
    return %c0_i32 : i32
  }
  func.func @transform_2(%arg0: i32) -> (i32, i32) {
    %c0_i32 = arith.constant 0 : i32
    %c0_i32_0 = arith.constant 0 : i32
    return %arg0, %c0_i32 : i32, i32
  }
  func.func @transform_3(%arg0: i32) -> (i32, i32) {
    %c0_i32 = arith.constant 0 : i32
    %c0_i32_0 = arith.constant 0 : i32
    return %arg0, %c0_i32 : i32, i32
  }
  func.func @transform_4(%arg0: i32) -> (i32, i32) {
    %c0_i32 = arith.constant 0 : i32
    %c0_i32_0 = arith.constant 0 : i32
    return %arg0, %c0_i32 : i32, i32
  }
}

</mosaic_0001>

<bundles_post_ra>
// kernel: tpu_custom_call.1
= control target key start
LH: loop header
LB: loop body
LE: loop exit
PB: predicated region body
PF: predicated region fallthrough
CT: control target
= control target key end

     0   :  { %9 = vsyncpa [#allocation4], 0  ;;  %s570_s0 = inlined_call_operand.vmem [shape: f32[15], index: 0, kind: input, shape index: {}]   ;;  %s571_s1 = inlined_call_operand.vmem [shape: f32[3], index: 1, kind: input, shape index: {}]   ;;  %s572_s2 = inlined_call_operand.vmem [shape: s32[8,1], index: 2, kind: input, shape index: {}]   ;;  %s573_s3 = inlined_call_operand.hbm [shape: f32[8,256], index: 3, kind: input, shape index: {}]   ;;  %s574_s4 = inlined_call_operand.vmem [shape: f32[8,1], index: 4, kind: output, shape index: {}]  }
   0x1   :  { %10 = vsyncpa [#allocation6], 0  ;;  %s17_s17 = sshll.u32 %s570_s0, 4  ;;  %s18_s17 = int_to_ptr.vmem [resolvable:$true] %s17_s17 }
   0x2   :  { %11 = vsyncpa [#allocation3], 0  ;;  %s26_s20 = sshll.u32 %s571_s1, 4  ;;  %s393_s21 = smov [#allocation2]   ;;  %s27_s20 = int_to_ptr.vmem [resolvable:$true] %s26_s20 }
   0x3   :  { %20 = dma.vmem_to_smem %s18_s17, 16, %s393_s21, [#allocation4]  }
   0x4   :  { %s394_s22 = smov [#allocation5]   ;;  %s37_s25 = sshll.u32 %s573_s3, 4  ;;  %s38_s25 = int_to_ptr.hbm [resolvable:$true] %s37_s25 }
   0x5   :  { %29 = dma.vmem_to_smem %s27_s20, 16, %s394_s22, [#allocation6]  }
   0x6   :  { %s395_s26 = smov [#allocation7]  }
   0x7   :  { %s39_s27 = sshll.u32 %s395_s26, 4  ;;  %s40_s27 = int_to_ptr.vmem [resolvable:$true] %s39_s27 }
   0x8   :  { %42 = dma.hbm_to_vmem [thread:$0]  %s38_s25, 256, %s40_s27, [#allocation3]  }
   0x9   :  { %387 = dma.done.wait [#allocation4], 16  }
   0xa   :  { %388 = vsyncadd [#allocation4], 4294967280 }
   0xb   :  { %389 = dma.done.wait [#allocation6], 16  }
   0xc   :  { %390 = vsyncadd [#allocation6], 4294967280 }
   0xd   :  { %391 = dma.done.wait [#allocation3], 256  }
   0xe   :  { %392 = vsyncadd [#allocation3], 4294967040 }
   0xf   :  { %55 = sfence }
  0x10   :  { %v56_v0 = vld [vmem:[%s572_s2] sm:$0xff]  ;;  %v396_v1 = vmov 0   ;;  %v57_v2 = vlaneseq  ;;  %v66_v6 = vld [vmem:[#allocation7 + $0x8] sm:$0xff]  ;;  %s397_s2 = smov 3   ;;  %s398_s3 = smov 2   ;;  %vm285_vm11 = vcmask 7168  }
  0x11   :  { %320 = vset.pattern.permute.xlu0 %v396_v1  ;;  %v65_v5 = vld [vmem:[#allocation7] sm:$0xff]  ;;  %s399_s28 = smov 1   ;;  %s400_s29 = smov 127  }
  0x12   :  { %61 = vperm.xlu0 %320, %v56_v0   ;;  %v440_v3 = vand.u32 127, %v57_v2  ;;  %s401_s30 = smov 126   ;;  %s402_s5 = smov 125  }
  0x13   :  { %s473_s6 = sld [smem:[#allocation2 + $0x1]] }
  0x14   :  { %v443_v4 = vadd.s32 128, %v440_v3  ;;  %s475_s7 = sld [smem:[#allocation2 + $0x5]]  ;;  %vm87_vm2 = vcmp.lt.s32.totalorder %v440_v3, 2  ;;  %vm101_vm3 = vcmp.lt.s32.totalorder %v440_v3, 3  ;;  %vm73_vm4 = vcmp.lt.s32.totalorder %v440_v3, 1 }
  0x15   :  { %s301_s8 = sld [smem:[#allocation2 + $0x8]]  ;;  %vm80_vm5 = vcmp.lt.s32.totalorder %v440_v3, 127  ;;  %vm94_vm6 = vcmp.lt.s32.totalorder %v440_v3, 126  ;;  %vm108_vm7 = vcmp.lt.s32.totalorder %v440_v3, 125 }
  0x16   :  { %s477_s9 = sld [smem:[#allocation2 + $0xb]] }
  0x17   :  { %s479_s10 = sld [smem:[#allocation2 + $0x9]] }
  0x18   :  { %s481_s11 = sld [smem:[#allocation2]] }
  0x19   :  { %s483_s12 = sld [smem:[#allocation2 + $0x3]]  ;;  %v132_v16 = vstv %s473_s6 }
  0x1a   :  { %s485_s13 = sld [smem:[#allocation2 + $0x4]]  ;;  %v179_v17 = vstv %s475_s7 }
  0x1b   :  { %s487_s14 = sld [smem:[#allocation2 + $0xa]]  ;;  %v223_v14 = vstv %s301_s8 }
  0x1c   :  { %s491_s15 = sld [smem:[#allocation2 + $0x2]]  ;;  %v236_v30 = vstv %s477_s9 }
  0x1d   :  { %s494_s16 = sld [smem:[#allocation2 + $0xc]]  ;;  %v226_v18 = vstv %s479_s10 }
  0x1e   :  { %v129_v25 = vstv %s481_s11  ;;  %s505_s17 = sld [smem:[#allocation2 + $0x6]] }
  0x1f   :  { %v171_v31 = vstv %s483_s12  ;;  %s513_s18 = sld [smem:[#allocation2 + $0x7]] }
  0x20   :  { %v174_v36 = vstv %s485_s13  ;;  %s517_s19 = sld [smem:[#allocation2 + $0xd]] }
  0x21   :  { %v231_v37 = vstv %s487_s14  ;;  %s521_s20 = sld [smem:[#allocation2 + $0xe]] }
  0x22   :  { %v137_v44 = vstv %s491_s15  ;;  %s126_s21 = sld [smem:[#allocation5]] }
  0x23   :  { %v241_v45 = vstv %s494_s16  ;;  %s308_s22 = sld [smem:[#allocation5 + $0x1]] }
  0x24   :  { %v184_v62 = vstv %s505_s17  ;;  %s309_s23 = sld [smem:[#allocation5 + $0x2]] }
  0x84   :  { %v445_v7 = vpop.permute.xlu0 %61 }
  0x85   :  { %vm63_vm0 = vcmp.lt.s32.totalorder %v440_v3, %v445_v7  ;;  %vm64_vm1 = vcmp.lt.s32.totalorder %v443_v4, %v445_v7 }
  0x86   :  { %v454_v8 = vsel %vm63_vm0, %v65_v5, 0.0  ;;  %v459_v9 = vsel %vm64_vm1, %v66_v6, 0.0 }
  0x87   :  { %99 = vrot.lane.b32.xlu2 %v459_v9, %s397_s2  ;;  %85 = vrot.lane.b32.xlu1 %v459_v9, %s398_s3  ;;  %v134_v28 = vmul.f32 %v132_v16, %v459_v9  ;;  %v133_v33 = vmul.f32 %v132_v16, %v454_v8  ;;  %v181_v34 = vmul.f32 %v179_v17, %v459_v9 }
  0x88   :  { %83 = vrot.lane.b32.xlu0 %v454_v8, %s398_s3  ;;  %v238_v41 = vmul.f32 %v236_v30, %v459_v9  ;;  %v180_v63 = vmul.f32 %v179_v17, %v454_v8  ;;  %v237_v0 = vmul.f32 %v236_v30, %v454_v8 }
  0x8f   :  { %69 = vrot.lane.b32.xlu2 %v454_v8, %s399_s28  ;;  %97 = vrot.lane.b32.xlu1 %v454_v8, %s397_s2 }
  0x90   :  { %71 = vrot.lane.b32.xlu0 %v459_v9, %s399_s28 }
  0x97   :  { %78 = vrot.lane.b32.xlu2 %v459_v9, %s400_s29  ;;  %76 = vrot.lane.b32.xlu1 %v454_v8, %s400_s29 }
  0x98   :  { %90 = vrot.lane.b32.xlu0 %v454_v8, %s401_s30 }
  0x9f   :  { %104 = vrot.lane.b32.xlu2 %v454_v8, %s402_s5  ;;  %92 = vrot.lane.b32.xlu1 %v459_v9, %s401_s30 }
  0xa0   :  { %106 = vrot.lane.b32.xlu0 %v459_v9, %s402_s5 }
  0xe1   :  { %v100_v10 = vpop.permute.xlu2 %99 }
  0xe9   :  { %v70_v13 = vpop.permute.xlu2 %69 }
  0xf1   :  { %v79_v46 = vpop.permute.xlu2 %78 }
  0xf9   :  { %v86_v11 = vpop.permute.xlu1 %85  ;;  %v105_v30 = vpop.permute.xlu2 %104 }
  0xfa   :  { %v84_v12 = vpop.permute.xlu0 %83 }
  0xfb   :  { %v89_v19 = vsel %vm87_vm2, %v86_v11, %v84_v12  ;;  %v88_v23 = vsel %vm87_vm2, %v84_v12, %v86_v11  ;;  %v189_v12 = vstv %s513_s18 }
  0xfc   :  { %v227_v32 = vmul.f32 %v226_v18, %v89_v19  ;;  %v228_v35 = vmul.f32 %v226_v18, %v88_v23  ;;  %v172_v42 = vmul.f32 %v171_v31, %v89_v19  ;;  %v173_v47 = vmul.f32 %v171_v31, %v88_v23 }
 0x101   :  { %v98_v15 = vpop.permute.xlu1 %97 }
 0x102   :  { %v102_v20 = vsel %vm101_vm3, %v98_v15, %v100_v10  ;;  %v103_v21 = vsel %vm101_vm3, %v100_v10, %v98_v15  ;;  %v72_v22 = vpop.permute.xlu0 %71 }
 0x103   :  { %v224_v24 = vmul.f32 %v223_v14, %v103_v21  ;;  %v75_v26 = vsel %vm73_vm4, %v72_v22, %v70_v13  ;;  %v225_v27 = vmul.f32 %v223_v14, %v102_v20  ;;  %v74_v29 = vsel %vm73_vm4, %v70_v13, %v72_v22 }
 0x104   :  { %v130_v38 = vmul.f32 %v129_v25, %v75_v26  ;;  %v131_v40 = vmul.f32 %v129_v25, %v74_v29  ;;  %v175_v48 = vmul.f32 %v174_v36, %v75_v26  ;;  %v176_v49 = vmul.f32 %v174_v36, %v74_v29 }
 0x105   :  { %v229_v39 = vadd.f32 %v227_v32, %v224_v24  ;;  %v230_v43 = vadd.f32 %v228_v35, %v225_v27  ;;  %v232_v50 = vmul.f32 %v231_v37, %v75_v26  ;;  %v233_v53 = vmul.f32 %v231_v37, %v74_v29 }
 0x106   :  { %v135_v52 = vadd.f32 %v133_v33, %v130_v38  ;;  %v136_v57 = vadd.f32 %v134_v28, %v131_v40  ;;  %v177_v1 = vadd.f32 %v175_v48, %v172_v42  ;;  %v178_v2 = vadd.f32 %v176_v49, %v173_v47 }
 0x107   :  { %v234_v58 = vadd.f32 %v232_v50, %v229_v39  ;;  %v235_v61 = vadd.f32 %v233_v53, %v230_v43  ;;  %v246_v14 = vstv %s517_s19  ;;  %v251_v24 = vstv %s521_s20 }
 0x108   :  { %v182_v21 = vadd.f32 %v180_v63, %v177_v1  ;;  %v183_v22 = vadd.f32 %v181_v34, %v178_v2 }
 0x109   :  { %v77_v51 = vpop.permute.xlu1 %76  ;;  %v239_v13 = vadd.f32 %v237_v0, %v234_v58  ;;  %v240_v19 = vadd.f32 %v238_v41, %v235_v61 }
 0x10a   :  { %v81_v54 = vsel %vm80_vm5, %v77_v51, %v79_v46  ;;  %v82_v55 = vsel %vm80_vm5, %v79_v46, %v77_v51  ;;  %v91_v56 = vpop.permute.xlu0 %90 }
 0x10b   :  { %v138_v59 = vmul.f32 %v137_v44, %v81_v54  ;;  %v139_v60 = vmul.f32 %v137_v44, %v82_v55  ;;  %v242_v10 = vmul.f32 %v241_v45, %v81_v54  ;;  %v243_v11 = vmul.f32 %v241_v45, %v82_v55 }
 0x10c   :  { %v185_v17 = vmul.f32 %v184_v62, %v81_v54  ;;  %v186_v18 = vmul.f32 %v184_v62, %v82_v55 }
 0x10d   :  { %v140_v5 = vadd.f32 %v138_v59, %v135_v52  ;;  %v141_v6 = vadd.f32 %v139_v60, %v136_v57  ;;  %v244_v25 = vadd.f32 %v242_v10, %v239_v13  ;;  %v245_v26 = vadd.f32 %v243_v11, %v240_v19 }
 0x10e   :  { %v187_v34 = vadd.f32 %v185_v17, %v182_v21  ;;  %v188_v36 = vadd.f32 %v186_v18, %v183_v22 }
 0x10f   :  { %v142_v15 = vsel %vm63_vm0, %v140_v5, -1e+30  ;;  %v143_v16 = vsel %vm64_vm1, %v141_v6, -1e+30 }
 0x110   :  { %v144_v20 = vmax.f32 %v142_v15, %v143_v16 }
 0x111   :  { %v93_v23 = vpop.permute.xlu1 %92 }
 0x112   :  { %v95_v27 = vsel %vm94_vm6, %v91_v56, %v93_v23  ;;  %v96_v28 = vsel %vm94_vm6, %v93_v23, %v91_v56  ;;  %v107_v29 = vpop.permute.xlu0 %106  ;;  %145 = vmax.xlane.f32.xlu1 %v144_v20 }
 0x113   :  { %v190_v31 = vmul.f32 %v189_v12, %v95_v27  ;;  %v191_v32 = vmul.f32 %v189_v12, %v96_v28  ;;  %v247_v33 = vmul.f32 %v246_v14, %v95_v27  ;;  %v248_v35 = vmul.f32 %v246_v14, %v96_v28 }
 0x114   :  { %v109_v37 = vsel %vm108_vm7, %v105_v30, %v107_v29  ;;  %v110_v38 = vsel %vm108_vm7, %v107_v29, %v105_v30 }
 0x115   :  { %v249_v39 = vadd.f32 %v247_v33, %v244_v25  ;;  %v250_v40 = vadd.f32 %v248_v35, %v245_v26  ;;  %v252_v41 = vmul.f32 %v251_v24, %v109_v37  ;;  %v253_v42 = vmul.f32 %v251_v24, %v110_v38 }
 0x116   :  { %v192_v43 = vadd.f32 %v190_v31, %v187_v34  ;;  %v193_v44 = vadd.f32 %v191_v32, %v188_v36 }
 0x117   :  { %v254_v45 = vadd.f32 %v252_v41, %v249_v39  ;;  %v255_v46 = vadd.f32 %v253_v42, %v250_v40  ;;  %v168_v41 = vstv %s126_s21  ;;  %v220_v42 = vstv %s308_s22 }
 0x118   :  { %v194_v47 = vsel %vm63_vm0, %v192_v43, -1e+30  ;;  %v195_v48 = vsel %vm64_vm1, %v193_v44, -1e+30 }
 0x119   :  { %v196_v49 = vmax.f32 %v194_v47, %v195_v48  ;;  %v256_v50 = vsel %vm63_vm0, %v254_v45, -1e+30  ;;  %v257_v51 = vsel %vm64_vm1, %v255_v46, -1e+30  ;;  %v282_v46 = vstv %s309_s23 }
 0x11a   :  { %v258_v52 = vmax.f32 %v256_v50, %v257_v51 }
 0x11b   :  { %197 = vmax.xlane.f32.xlu2 %v196_v49 }
 0x11c   :  { %259 = vmax.xlane.f32.xlu0 %v258_v52 }
 0x185   :  { %v146_v53 = vpop.xlane.xlu1 %145 }
 0x186   :  { %v147_v54 = vsub.f32 %v142_v15, %v146_v53  ;;  %v148_v55 = vsub.f32 %v143_v16, %v146_v53 }
 0x188   :  { %v149_v56 = vmul.f32 1.442695, %v147_v54  ;;  %v151_v57 = vmul.f32 1.442695, %v148_v55 }
 0x18a   :  { %321 = vpow2.f32 %v149_v56 }
 0x18b   :  { %323 = vpow2.f32 %v151_v57 }
 0x18e   :  { %v198_v58 = vpop.xlane.xlu2 %197 }
 0x18f   :  { %v199_v59 = vsub.f32 %v194_v47, %v198_v58  ;;  %v200_v60 = vsub.f32 %v195_v48, %v198_v58  ;;  %v260_v61 = vpop.xlane.xlu0 %259 }
 0x190   :  { %v322_v3 = vpop.eup %321  ;;  %v261_v62 = vsub.f32 %v256_v50, %v260_v61  ;;  %v262_v63 = vsub.f32 %v257_v51, %v260_v61 }
 0x191   :  { %v324_v0 = vpop.eup %323  ;;  %v201_v4 = vmul.f32 1.442695, %v199_v59  ;;  %v203_v7 = vmul.f32 1.442695, %v200_v60  ;;  %v153_v1 = vmul.f32 %v322_v3, %v454_v8 }
 0x192   :  { %v263_v2 = vmul.f32 1.442695, %v261_v62  ;;  %v265_v5 = vmul.f32 1.442695, %v262_v63  ;;  %v158_v6 = vadd.f32 %v324_v0, %v322_v3  ;;  %v154_v10 = vmul.f32 %v324_v0, %v459_v9 }
 0x193   :  { %325 = vpow2.f32 %v201_v4 }
 0x194   :  { %327 = vpow2.f32 %v203_v7  ;;  %159 = vadd.xlane.f32.xlu2 %v158_v6  ;;  %v155_v11 = vadd.f32 %v154_v10, %v153_v1 }
 0x195   :  { %329 = vpow2.f32 %v263_v2 }
 0x196   :  { %331 = vpow2.f32 %v265_v5  ;;  %156 = vadd.xlane.f32.xlu0 %v155_v11 }
 0x199   :  { %v326_v12 = vpop.eup %325 }
 0x19a   :  { %v328_v13 = vpop.eup %327  ;;  %v205_v18 = vmul.f32 %v326_v12, %v454_v8 }
 0x19b   :  { %v330_v14 = vpop.eup %329  ;;  %v210_v15 = vadd.f32 %v328_v13, %v326_v12  ;;  %v206_v19 = vmul.f32 %v328_v13, %v459_v9 }
 0x19c   :  { %v332_v16 = vpop.eup %331  ;;  %v267_v20 = vmul.f32 %v330_v14, %v454_v8 }
 0x19d   :  { %211 = vadd.xlane.f32.xlu1 %v210_v15  ;;  %v272_v17 = vadd.f32 %v332_v16, %v330_v14  ;;  %v268_v21 = vmul.f32 %v332_v16, %v459_v9  ;;  %v207_v22 = vadd.f32 %v206_v19, %v205_v18 }
 0x19f   :  { %273 = vadd.xlane.f32.xlu2 %v272_v17  ;;  %v269_v23 = vadd.f32 %v268_v21, %v267_v20 }
 0x1a5   :  { %208 = vadd.xlane.f32.xlu1 %v207_v22 }
 0x1a7   :  { %270 = vadd.xlane.f32.xlu2 %v269_v23 }
 0x207   :  { %v160_v24 = vpop.xlane.xlu2 %159 }
 0x208   :  { %vm161_vm8 = vcmp.gt.f32.partialorder %v160_v24, 0.0 }
 0x209   :  { %v162_v25 = vsel %vm161_vm8, %v160_v24, 1.0  ;;  %v157_v37 = vpop.xlane.xlu0 %156 }
 0x20a   :  { %333 = vrcp.f32 %v162_v25 }
 0x210   :  { %v334_v26 = vpop.eup %333  ;;  %v212_v27 = vpop.xlane.xlu1 %211 }
 0x211   :  { %vm213_vm9 = vcmp.gt.f32.partialorder %v212_v27, 0.0  ;;  %v164_v28 = vmul.f32 %v334_v26, %v162_v25 }
 0x212   :  { %v214_v29 = vsel %vm213_vm9, %v212_v27, 1.0  ;;  %v274_v30 = vpop.xlane.xlu2 %273 }
 0x213   :  { %335 = vrcp.f32 %v214_v29  ;;  %vm275_vm10 = vcmp.gt.f32.partialorder %v274_v30, 0.0  ;;  %v165_v8 = vsub.f32 2.0, %v164_v28 }
 0x214   :  { %v276_v31 = vsel %vm275_vm10, %v274_v30, 1.0 }
 0x215   :  { %337 = vrcp.f32 %v276_v31  ;;  %v166_v32 = vmul.f32 %v334_v26, %v165_v8 }
 0x217   :  { %v167_v38 = vmul.f32 %v166_v32, %v157_v37 }
 0x218   :  { %v209_v43 = vpop.xlane.xlu1 %208 }
 0x219   :  { %v336_v9 = vpop.eup %335  ;;  %v169_v48 = vmul.f32 %v168_v41, %v167_v38 }
 0x21a   :  { %v216_v33 = vmul.f32 %v336_v9, %v214_v29  ;;  %v271_v47 = vpop.xlane.xlu2 %270 }
 0x21b   :  { %v338_v35 = vpop.eup %337 }
 0x21c   :  { %v217_v34 = vsub.f32 2.0, %v216_v33  ;;  %v278_v36 = vmul.f32 %v338_v35, %v276_v31 }
 0x21e   :  { %v279_v39 = vsub.f32 2.0, %v278_v36  ;;  %v218_v40 = vmul.f32 %v336_v9, %v217_v34 }
 0x220   :  { %v219_v44 = vmul.f32 %v218_v40, %v209_v43  ;;  %v280_v45 = vmul.f32 %v338_v35, %v279_v39 }
 0x222   :  { %v221_v49 = vmul.f32 %v220_v42, %v219_v44  ;;  %v281_v50 = vmul.f32 %v280_v45, %v271_v47 }
 0x224   :  { %v222_v51 = vadd.f32 %v221_v49, %v169_v48  ;;  %v283_v52 = vmul.f32 %v282_v46, %v281_v50 }
 0x226   :  { %v284_v53 = vadd.f32 %v283_v52, %v222_v51 }
 0x228   :  { %286 = vst.msk [vmem:[%s574_s4] sm:$0xff] %vm285_vm11, %v284_v53 }
 0x229   :  { %291 = vsyncpa [#allocation3], 1 }
 0x22a   :  { %292 = vsyncpa [#allocation4], 1 }
 0x22b   :  { %293 = vsyncpa [#allocation6], 1 }

</bundles_post_ra>
